<compile_context>
chip_gen: v5e
topology: v5e:2x2
jax: 0.10.0
libtpu: 0.0.40
codegen_flags: <defaults>
</compile_context>

<pallas_src>
import jax
import jax.numpy as jnp
from jax.experimental import pallas as pl
from jax.experimental.pallas import tpu as pltpu


def _cfc_kernel(inp_ref, hx_ref, ts_ref,
                wbi_ref, wbh_ref, bbb_ref,
                wh_ref, bh_ref,
                o_ref):
    H = o_ref.shape[-1]

    # bf16 activations into the MXU, f32 accumulation.
    x_in = inp_ref[...].astype(jnp.bfloat16)
    x_hx = hx_ref[...].astype(jnp.bfloat16)

    # Backbone: (inp @ W_in + hx @ W_hx + b) -> LeCun (1.7159 * tanh(0.666 z))
    z = (jnp.dot(x_in, wbi_ref[...], preferred_element_type=jnp.float32)
         + jnp.dot(x_hx, wbh_ref[...], preferred_element_type=jnp.float32)
         + bbb_ref[...])
    h = 1.7159 * jnp.tanh(0.666 * z)

    # Fused heads: one [U, 4H] matmul, then static lane slices.
    heads = (jnp.dot(h.astype(jnp.bfloat16), wh_ref[...],
                     preferred_element_type=jnp.float32)
             + bh_ref[...])
    ff1 = jnp.tanh(heads[:, 0 * H:1 * H])
    ff2 = jnp.tanh(heads[:, 1 * H:2 * H])
    t_a = heads[:, 2 * H:3 * H]
    t_b = heads[:, 3 * H:4 * H]

    ts = ts_ref[...]                              # [TB, 1] broadcast over H
    t_interp = jax.nn.sigmoid(t_a * ts + t_b)

    # mode == 'default':  ff1*(1-t) + t*ff2  ==  ff1 + t*(ff2-ff1)
    new_hidden = ff1 + t_interp * (ff2 - ff1)
    o_ref[...] = new_hidden.astype(o_ref.dtype)


def pack_params(params, input_size):
    """Split the backbone weight, fuse head weights, cast weights to bf16."""
    return {
        "w_bb_in": params["w_bb"][:input_size].astype(jnp.bfloat16),
        "w_bb_hx": params["w_bb"][input_size:].astype(jnp.bfloat16),
        "b_bb": params["b_bb"].astype(jnp.float32),
        "w_heads": jnp.concatenate(
            [params["w_ff1"], params["w_ff2"],
             params["w_ta"], params["w_tb"]], axis=1).astype(jnp.bfloat16),
        "b_heads": jnp.concatenate(
            [params["b_ff1"], params["b_ff2"],
             params["b_ta"], params["b_tb"]], axis=1).astype(jnp.float32),
    }


def cfc_cell_forward(inp, hx, ts, packed, *, block_b=512):
    """CfCCell forward in a single batch-tiled Pallas kernel."""
    B, IN = inp.shape
    H = hx.shape[1]
    U = packed["w_bb_in"].shape[1]
    H4 = packed["w_heads"].shape[1]

    # Batch tile: whole batch if small, otherwise block_b rows (mult. of 8).
    if B <= block_b:
        TB, Bp = B, B
    else:
        TB = block_b
        Bp = -(-B // TB) * TB
    if Bp != B:
        pad = Bp - B
        inp = jnp.pad(inp, ((0, pad), (0, 0)))
        hx = jnp.pad(hx, ((0, pad), (0, 0)))
        ts = jnp.pad(ts, ((0, pad), (0, 0)))

    grid = (Bp // TB,)

    batch_spec = lambda cols: pl.BlockSpec((TB, cols), lambda i: (i, 0))
    resident = lambda shape: pl.BlockSpec(shape, lambda i: (0, 0))

    out = pl.pallas_call(
        _cfc_kernel,
        out_shape=jax.ShapeDtypeStruct((Bp, H), jnp.float32),
        grid=grid,
        in_specs=[
            batch_spec(IN),                 # inp
            batch_spec(H),                  # hx
            batch_spec(1),                  # ts
            resident((IN, U)),              # w_bb_in   (VMEM-resident)
            resident((H, U)),               # w_bb_hx
            resident((1, U)),               # b_bb
            resident((U, H4)),              # w_heads (fused 4 heads)
            resident((1, H4)),              # b_heads
        ],
        out_specs=batch_spec(H),
        compiler_params=pltpu.CompilerParams(
            dimension_semantics=("parallel",)),
    )(inp, hx, ts,
      packed["w_bb_in"], packed["w_bb_hx"], packed["b_bb"],
      packed["w_heads"], packed["b_heads"])

    return out[:B] if Bp != B else out


def _xavier_uniform(key, fan_in, fan_out):
    # matches torch.nn.init.xavier_uniform_ bound; already transposed so the
    # kernel computes x @ W.
    bound = (6.0 / (fan_in + fan_out)) ** 0.5
    return jax.random.uniform(key, (fan_in, fan_out), jnp.float32, -bound, bound)


def make_params(key, input_size, hidden_size, backbone_units):
    cat = input_size + hidden_size
    ks = jax.random.split(key, 10)
    return {
        "w_bb":  _xavier_uniform(ks[0], cat, backbone_units),
        "b_bb":  jax.random.uniform(ks[1], (1, backbone_units), jnp.float32, -0.1, 0.1),
        "w_ff1": _xavier_uniform(ks[2], backbone_units, hidden_size),
        "b_ff1": jax.random.uniform(ks[3], (1, hidden_size), jnp.float32, -0.1, 0.1),
        "w_ff2": _xavier_uniform(ks[4], backbone_units, hidden_size),
        "b_ff2": jax.random.uniform(ks[5], (1, hidden_size), jnp.float32, -0.1, 0.1),
        "w_ta":  _xavier_uniform(ks[6], backbone_units, hidden_size),
        "b_ta":  jax.random.uniform(ks[7], (1, hidden_size), jnp.float32, -0.1, 0.1),
        "w_tb":  _xavier_uniform(ks[8], backbone_units, hidden_size),
        "b_tb":  jax.random.uniform(ks[9], (1, hidden_size), jnp.float32, -0.1, 0.1),
    }


def reference_forward(inp, hx, ts, p):
    """Pure-JAX f32 reference of the PyTorch forward (mode='default', lecun)."""
    x = jnp.concatenate([inp, hx], axis=1)
    h = 1.7159 * jnp.tanh(0.666 * (x @ p["w_bb"] + p["b_bb"]))
    ff1 = jnp.tanh(h @ p["w_ff1"] + p["b_ff1"])
    ff2 = jnp.tanh(h @ p["w_ff2"] + p["b_ff2"])
    t_a = h @ p["w_ta"] + p["b_ta"]
    t_b = h @ p["w_tb"] + p["b_tb"]
    t_interp = jax.nn.sigmoid(t_a * ts + t_b)
    return ff1 * (1.0 - t_interp) + t_interp * ff2


# TODO(synk): sequence-loop variant (time axis as a trailing "arbitrary" grid
# axis with VMEM-resident weights) not implemented; this kernel covers a
# single cell step, matching the PyTorch module's forward.

if __name__ == "__main__":
    batch = 8
    input_size = 16
    hidden_size = 32        # 4*H == 128 -> one lane-dense fused head matmul
    backbone_units = 128

    key = jax.random.PRNGKey(0)
    k_in, k_hx, k_ts, k_par = jax.random.split(key, 4)

    inp = jax.random.normal(k_in, (batch, input_size), jnp.float32)
    hx = jax.random.normal(k_hx, (batch, hidden_size), jnp.float32)
    ts = jax.random.uniform(k_ts, (batch, 1), jnp.float32, 0.1, 1.0)

    params = make_params(k_par, input_size, hidden_size, backbone_units)
    packed = pack_params(params, input_size)

    out = cfc_cell_forward(inp, hx, ts, packed)
    out = jax.block_until_ready(out)

    ref = reference_forward(inp, hx, ts, params)
    assert out.shape == (batch, hidden_size)
    # bf16 matmuls with f32 accumulation vs. pure-f32 reference
    assert jnp.allclose(out, ref, atol=3e-2, rtol=3e-2), "mismatch vs JAX reference"

    print("KERNEL_OK")
</pallas_src>

<mosaic_0001>
module attributes {stable_mosaic.version = 11 : i64} {
  func.func @_cfc_kernel(%arg0: i32, %arg1: memref<8x16xf32, #tpu.memory_space<vmem>>, %arg2: memref<8x32xf32, #tpu.memory_space<vmem>>, %arg3: memref<8x1xf32, #tpu.memory_space<vmem>>, %arg4: memref<16x128xbf16, #tpu.memory_space<vmem>>, %arg5: memref<32x128xbf16, #tpu.memory_space<vmem>>, %arg6: memref<1x128xf32, #tpu.memory_space<vmem>>, %arg7: memref<128x128xbf16, #tpu.memory_space<vmem>>, %arg8: memref<1x128xf32, #tpu.memory_space<vmem>>, %arg9: memref<8x32xf32, #tpu.memory_space<vmem>>) attributes {dimension_semantics = [#tpu.dimension_semantics<parallel>], iteration_bounds = array<i64: 1>, scalar_prefetch = 0 : i64, scratch_operands = 0 : i64, tpu.core_type = #tpu.core_type<tc>, window_params = [{transform_indices = @transform_0, window_bounds = array<i64: 8, 16>}, {transform_indices = @transform_1, window_bounds = array<i64: 8, 32>}, {transform_indices = @transform_2, window_bounds = array<i64: 8, 1>}, {pipeline_mode = #tpu.pipeline_mode<synchronous>, transform_indices = @transform_3, window_bounds = array<i64: 16, 128>}, {pipeline_mode = #tpu.pipeline_mode<synchronous>, transform_indices = @transform_4, window_bounds = array<i64: 32, 128>}, {pipeline_mode = #tpu.pipeline_mode<synchronous>, transform_indices = @transform_5, window_bounds = array<i64: 1, 128>}, {pipeline_mode = #tpu.pipeline_mode<synchronous>, transform_indices = @transform_6, window_bounds = array<i64: 128, 128>}, {pipeline_mode = #tpu.pipeline_mode<synchronous>, transform_indices = @transform_7, window_bounds = array<i64: 1, 128>}, {transform_indices = @transform_8, window_bounds = array<i64: 8, 32>}]} {
    %c0 = arith.constant 0 : index
    %c0_0 = arith.constant 0 : index
    %0 = vector.load %arg1[%c0, %c0_0] : memref<8x16xf32, #tpu.memory_space<vmem>>, vector<8x16xf32>
    %1 = arith.truncf %0 : vector<8x16xf32> to vector<8x16xbf16>
    %c0_1 = arith.constant 0 : index
    %c0_2 = arith.constant 0 : index
    %2 = vector.load %arg2[%c0_1, %c0_2] : memref<8x32xf32, #tpu.memory_space<vmem>>, vector<8x32xf32>
    %3 = arith.truncf %2 : vector<8x32xf32> to vector<8x32xbf16>
    %c0_3 = arith.constant 0 : index
    %c0_4 = arith.constant 0 : index
    %4 = vector.load %arg4[%c0_3, %c0_4] : memref<16x128xbf16, #tpu.memory_space<vmem>>, vector<16x128xbf16>
    %cst = arith.constant dense<0.000000e+00> : vector<8x128xf32>
    %5 = tpu.matmul %1, %4, %cst {dimension_numbers = #tpu.dot_dimension_numbers<[1], [0], [0], [1], [0, 0, 1, 1], [], []>} : vector<8x16xbf16>, vector<16x128xbf16>, vector<8x128xf32> -> vector<8x128xf32>
    %c0_5 = arith.constant 0 : index
    %c0_6 = arith.constant 0 : index
    %6 = vector.load %arg5[%c0_5, %c0_6] : memref<32x128xbf16, #tpu.memory_space<vmem>>, vector<32x128xbf16>
    %cst_7 = arith.constant dense<0.000000e+00> : vector<8x128xf32>
    %7 = tpu.matmul %3, %6, %cst_7 {dimension_numbers = #tpu.dot_dimension_numbers<[1], [0], [0], [1], [0, 0, 1, 1], [], []>} : vector<8x32xbf16>, vector<32x128xbf16>, vector<8x128xf32> -> vector<8x128xf32>
    %8 = arith.addf %5, %7 : vector<8x128xf32>
    %c0_8 = arith.constant 0 : index
    %c0_9 = arith.constant 0 : index
    %9 = vector.load %arg6[%c0_8, %c0_9] : memref<1x128xf32, #tpu.memory_space<vmem>>, vector<1x128xf32>
    %10 = vector.broadcast %9 : vector<1x128xf32> to vector<8x128xf32>
    %11 = arith.addf %8, %10 : vector<8x128xf32>
    %cst_10 = arith.constant 6.660000e-01 : f32
    %12 = vector.broadcast %cst_10 : f32 to vector<8x128xf32>
    %13 = arith.mulf %12, %11 : vector<8x128xf32>
    %14 = math.tanh %13 : vector<8x128xf32>
    %cst_11 = arith.constant 1.715900e+00 : f32
    %15 = vector.broadcast %cst_11 : f32 to vector<8x128xf32>
    %16 = arith.mulf %15, %14 : vector<8x128xf32>
    %17 = arith.truncf %16 : vector<8x128xf32> to vector<8x128xbf16>
    %c0_12 = arith.constant 0 : index
    %c0_13 = arith.constant 0 : index
    %18 = vector.load %arg7[%c0_12, %c0_13] : memref<128x128xbf16, #tpu.memory_space<vmem>>, vector<128x128xbf16>
    %cst_14 = arith.constant dense<0.000000e+00> : vector<8x128xf32>
    %19 = tpu.matmul %17, %18, %cst_14 {dimension_numbers = #tpu.dot_dimension_numbers<[1], [0], [0], [1], [0, 0, 1, 1], [], []>} : vector<8x128xbf16>, vector<128x128xbf16>, vector<8x128xf32> -> vector<8x128xf32>
    %c0_15 = arith.constant 0 : index
    %c0_16 = arith.constant 0 : index
    %20 = vector.load %arg8[%c0_15, %c0_16] : memref<1x128xf32, #tpu.memory_space<vmem>>, vector<1x128xf32>
    %21 = vector.broadcast %20 : vector<1x128xf32> to vector<8x128xf32>
    %22 = arith.addf %19, %21 : vector<8x128xf32>
    %23 = vector.extract_strided_slice %22 {offsets = [0, 0], sizes = [8, 32], strides = [1, 1]} : vector<8x128xf32> to vector<8x32xf32>
    %24 = math.tanh %23 : vector<8x32xf32>
    %25 = vector.extract_strided_slice %22 {offsets = [0, 32], sizes = [8, 32], strides = [1, 1]} : vector<8x128xf32> to vector<8x32xf32>
    %26 = math.tanh %25 : vector<8x32xf32>
    %27 = vector.extract_strided_slice %22 {offsets = [0, 64], sizes = [8, 32], strides = [1, 1]} : vector<8x128xf32> to vector<8x32xf32>
    %28 = vector.extract_strided_slice %22 {offsets = [0, 96], sizes = [8, 32], strides = [1, 1]} : vector<8x128xf32> to vector<8x32xf32>
    %c0_17 = arith.constant 0 : index
    %c0_18 = arith.constant 0 : index
    %29 = vector.load %arg3[%c0_17, %c0_18] : memref<8x1xf32, #tpu.memory_space<vmem>>, vector<8x1xf32>
    %30 = vector.broadcast %29 : vector<8x1xf32> to vector<8x32xf32>
    %31 = arith.mulf %27, %30 : vector<8x32xf32>
    %32 = arith.addf %31, %28 : vector<8x32xf32>
    %33 = arith.negf %32 : vector<8x32xf32>
    %34 = math.exp %33 : vector<8x32xf32>
    %cst_19 = arith.constant 1.000000e+00 : f32
    %35 = vector.broadcast %cst_19 : f32 to vector<8x32xf32>
    %36 = arith.addf %35, %34 : vector<8x32xf32>
    %37 = arith.divf %35, %36 : vector<8x32xf32>
    %38 = arith.subf %26, %24 : vector<8x32xf32>
    %39 = arith.mulf %37, %38 : vector<8x32xf32>
    %40 = arith.addf %24, %39 : vector<8x32xf32>
    %c0_20 = arith.constant 0 : index
    %c0_21 = arith.constant 0 : index
    %41 = vector.load %arg9[%c0_20, %c0_21] : memref<8x32xf32, #tpu.memory_space<vmem>>, vector<8x32xf32>
    tpu.vector_store %arg9[%c0_20, %c0_21], %40 {strides = array<i32>} : memref<8x32xf32, #tpu.memory_space<vmem>>, vector<8x32xf32>,
    return
  }
  func.func @transform_0(%arg0: i32) -> (i32, i32) {
    %c0_i32 = arith.constant 0 : i32
    %c0_i32_0 = arith.constant 0 : i32
    return %arg0, %c0_i32 : i32, i32
  }
  func.func @transform_1(%arg0: i32) -> (i32, i32) {
    %c0_i32 = arith.constant 0 : i32
    %c0_i32_0 = arith.constant 0 : i32
    return %arg0, %c0_i32 : i32, i32
  }
  func.func @transform_2(%arg0: i32) -> (i32, i32) {
    %c0_i32 = arith.constant 0 : i32
    %c0_i32_0 = arith.constant 0 : i32
    return %arg0, %c0_i32 : i32, i32
  }
  func.func @transform_3(%arg0: i32) -> (i32, i32) {
    %c0_i32 = arith.constant 0 : i32
    %c0_i32_0 = arith.constant 0 : i32
    %c0_i32_1 = arith.constant 0 : i32
    return %c0_i32, %c0_i32_0 : i32, i32
  }
  func.func @transform_4(%arg0: i32) -> (i32, i32) {
    %c0_i32 = arith.constant 0 : i32
    %c0_i32_0 = arith.constant 0 : i32
    %c0_i32_1 = arith.constant 0 : i32
    return %c0_i32, %c0_i32_0 : i32, i32
  }
  func.func @transform_5(%arg0: i32) -> (i32, i32) {
    %c0_i32 = arith.constant 0 : i32
    %c0_i32_0 = arith.constant 0 : i32
    %c0_i32_1 = arith.constant 0 : i32
    return %c0_i32, %c0_i32_0 : i32, i32
  }
  func.func @transform_6(%arg0: i32) -> (i32, i32) {
    %c0_i32 = arith.constant 0 : i32
    %c0_i32_0 = arith.constant 0 : i32
    %c0_i32_1 = arith.constant 0 : i32
    return %c0_i32, %c0_i32_0 : i32, i32
  }
  func.func @transform_7(%arg0: i32) -> (i32, i32) {
    %c0_i32 = arith.constant 0 : i32
    %c0_i32_0 = arith.constant 0 : i32
    %c0_i32_1 = arith.constant 0 : i32
    return %c0_i32, %c0_i32_0 : i32, i32
  }
  func.func @transform_8(%arg0: i32) -> (i32, i32) {
    %c0_i32 = arith.constant 0 : i32
    %c0_i32_0 = arith.constant 0 : i32
    return %arg0, %c0_i32 : i32, i32
  }
}

</mosaic_0001>

<bundles_post_ra>
// kernel: tpu_custom_call.1
= control target key start
LH: loop header
LB: loop body
LE: loop exit
PB: predicated region body
PF: predicated region fallthrough
CT: control target
= control target key end

     0   :  { %13 = vsyncpa [#allocation3], 0  ;;  %s609_s0 = inlined_call_operand.vmem [shape: f32[8,16], index: 0, kind: input, shape index: {}]   ;;  %s610_s1 = inlined_call_operand.hbm [shape: f32[8,32], index: 1, kind: input, shape index: {}]   ;;  %s611_s2 = inlined_call_operand.vmem [shape: f32[8,1], index: 2, kind: input, shape index: {}]   ;;  %s612_s3 = inlined_call_operand.hbm [shape: bf16[16,128], index: 3, kind: input, shape index: {}]   ;;  %s613_s4 = inlined_call_operand.hbm [shape: bf16[32,128], index: 4, kind: input, shape index: {}]   ;;  %s614_s5 = inlined_call_operand.vmem [shape: f32[1,128], index: 5, kind: input, shape index: {}]   ;;  %s615_s6 = inlined_call_operand.hbm [shape: bf16[128,128], index: 6, kind: input, shape index: {}]   ;;  %s616_s7 = inlined_call_operand.vmem [shape: f32[1,128], index: 7, kind: input, shape index: {}]   ;;  %s617_s8 = inlined_call_operand.hbm [shape: f32[8,32], index: 8, kind: output, shape index: {}]  }
   0x1   :  { %14 = vsyncpa [#allocation6], 0 }
   0x2   :  { %15 = vsyncpa [#allocation9], 0  ;;  %s36_s29 = sshll.u32 %s612_s3, 4  ;;  %s37_s29 = int_to_ptr.hbm [resolvable:$true] %s36_s29 }
   0x3   :  { %16 = vsyncpa [#allocation4], 0  ;;  %s518_s30 = smov [#allocation5]   ;;  %s24_s12 = sshll.u32 %s610_s1, 4  ;;  %s25_s12 = int_to_ptr.hbm [resolvable:$true] %s24_s12 }
   0x4   :  { %s38_s9 = sshll.u32 %s518_s30, 4  ;;  %s519_s13 = smov 64   ;;  %s39_s9 = int_to_ptr.vmem [resolvable:$true] %s38_s9 }
   0x5   :  { %s520_s14 = smov 4   ;;  %s521_s15 = smov [#allocation2]  }
   0x6   :  { %44 = dma.hbm_to_vmem [thread:$0]  %s37_s29, 128, %s39_s9, [#allocation6], %s519_s13, %s519_s13, %s520_s14  }
   0x7   :  { %s26_s16 = sshll.u32 %s521_s15, 4  ;;  %s49_s3 = sshll.u32 %s613_s4, 4  ;;  %s27_s16 = int_to_ptr.vmem [resolvable:$true] %s26_s16  ;;  %s50_s3 = int_to_ptr.hbm [resolvable:$true] %s49_s3 }
   0x8   :  { %29 = dma.hbm_to_vmem [thread:$0]  %s25_s12, 128, %s27_s16, [#allocation3]  }
   0x9   :  { %s64_s21 = sshll.u32 %s615_s6, 4  ;;  %s522_s1 = smov [#allocation7]   ;;  %s65_s21 = int_to_ptr.hbm [resolvable:$true] %s64_s21 }
   0xa   :  { %s51_s22 = sshll.u32 %s522_s1, 4  ;;  %s523_s23 = smov [#allocation8]   ;;  %s52_s22 = int_to_ptr.vmem [resolvable:$true] %s51_s22 }
   0xb   :  { %57 = dma.hbm_to_vmem [thread:$0]  %s50_s3, 256, %s52_s22, [#allocation6], %s519_s13, %s519_s13, %s520_s14  }
   0xc   :  { %s66_s24 = sshll.u32 %s523_s23, 4  ;;  %s67_s24 = int_to_ptr.vmem [resolvable:$true] %s66_s24 }
   0xd   :  { %72 = dma.hbm_to_vmem [thread:$0]  %s65_s21, 1024, %s67_s24, [#allocation9], %s519_s13, %s519_s13, %s520_s14  }
   0xe   :  { %510 = dma.done.wait [#allocation3], 128  }
   0xf   :  { %511 = vsyncadd [#allocation3], 4294967168 }
  0x10   :  { %512 = dma.done.wait [#allocation6], 384  }
  0x11   :  { %513 = vsyncadd [#allocation6], 4294966912 }
  0x12   :  { %514 = dma.done.wait [#allocation9], 1024  }
  0x13   :  { %515 = vsyncadd [#allocation9], 4294966272  ;;  %v360_v0 = vld [vmem:[#allocation7 + $0x8] sm:$0xff]  ;;  %v358_v1 = vld [vmem:[#allocation5] sm:$0xff]  ;;  %vm137_vm0 = vcmask 130048   ;;  %vm114_vm1 = vcmask 261120  }
  0x14   :  { %v92_v2 = vld [vmem:[%s609_s0] sm:$0xff]  ;;  %v368_v4 = vld [vmem:[#allocation8 + $0x38] sm:$0xff]  ;;  %124 = vmatpush.bf16.msra.mxu0 %v360_v0  ;;  %148 = vmatpush.bf16.msra.mxu1 %v358_v1  ;;  %v359_v5 = vld [vmem:[#allocation7] sm:$0xff]  ;;  %v524_v26 = vmov 0   ;;  %s526_s28 = smov 32   ;;  %s299_s11 = sshll.u32 %s617_s8, 4  ;;  %s300_s11 = int_to_ptr.hbm [resolvable:$true] %s299_s11 }
  0x15   :  { %v93_v3 = vpack.c.bf16 %v92_v2, %v92_v2  ;;  %v94_v6 = vld [vmem:[#allocation2] sm:$0xff]  ;;  %231 = vmatpush.bf16.msra.mxu2 %v368_v4  ;;  %v367_v7 = vld [vmem:[#allocation8 + $0x30] sm:$0xff]  ;;  %v366_v9 = vld [vmem:[#allocation8 + $0x28] sm:$0xff]  ;;  %379 = vset.pattern.permute.xlu0 %v524_v26 }
  0x16   :  { %v95_v8 = vpack.c.bf16 %v94_v6, %v94_v6  ;;  %v365_v10 = vld [vmem:[#allocation8 + $0x20] sm:$0xff]  ;;  %v364_v11 = vld [vmem:[#allocation8 + $0x18] sm:$0xff]  ;;  %v363_v12 = vld [vmem:[#allocation8 + $0x10] sm:$0xff] }
  0x17   :  { %324 = vmatmul.msk.bf16.vlgmr.msra.gmra.mxu1 %vm137_vm0, %v93_v3  ;;  %v362_v13 = vld [vmem:[#allocation8 + $0x8] sm:$0xff]  ;;  %v361_v14 = vld [vmem:[#allocation8] sm:$0xff] }
  0x18   :  { %125 = vmatpush.bf16.msra.mxu0 %v359_v5  ;;  %v380_v16 = vld [vmem:[%s614_s5] ss:$0 sm:$0xff]  ;;  %s525_s5 = smov 96  }
  0x19   :  { %232 = vmatpush.bf16.msra.mxu2 %v367_v7  ;;  %v381_v27 = vld [vmem:[%s616_s7] ss:$0 sm:$0xff] }
  0x1a   :  { %v245_v32 = vld [vmem:[%s611_s2] sm:$0xff]  ;;  %s527_s2 = smov [#allocation10]  }
  0x1b   :  { %319 = vmatmul.msk.bf16.vlgmr.msra.gmra.mxu0 %vm114_vm1, %v95_v8  ;;  %s297_s7 = sshll.u32 %s527_s2, 4  ;;  %s298_s7 = int_to_ptr.vmem [resolvable:$true] %s297_s7 }
  0x1d   :  { %233 = vmatpush.bf16.msra.mxu2 %v366_v9 }
  0x21   :  { %234 = vmatpush.bf16.msra.mxu2 %v365_v10 }
  0x25   :  { %235 = vmatpush.bf16.msra.mxu2 %v364_v11 }
  0x29   :  { %236 = vmatpush.bf16.msra.mxu2 %v363_v12 }
  0x2d   :  { %237 = vmatpush.bf16.msra.mxu2 %v362_v13 }
  0x31   :  { %238 = vmatpush.bf16.msra.mxu2 %v361_v14 }
  0x94   :  { %v150_v15 = vpop.f32.mrf.mxu1 }
  0x98   :  { %v127_v17 = vpop.f32.mrf.mxu0 }
  0x99   :  { %v151_v18 = vadd.f32 %v150_v15, %v127_v17 }
  0x9b   :  { %v158_v19 = vadd.f32 %v380_v16, %v151_v18 }
  0x9c   :  { %v152_v20 = vpop.f32.mrf.mxu1 }
  0x9d   :  { %v159_v21 = vmul.f32 0.666, %v158_v19 }
  0x9f   :  { %382 = vtanh.f32 %v159_v21 }
  0xa0   :  { %v129_v22 = vpop.f32.mrf.mxu0 }
  0xa5   :  { %v383_v23 = vpop.eup %382 }
  0xa6   :  { %v161_v24 = vmul.f32 1.7159, %v383_v23 }
  0xa8   :  { %v162_v25 = vpack.c.bf16 %v161_v24, %v161_v24 }
  0xaa   :  { %239 = vmatmul.bf16.vlgmr.msra.gmra.mxu2 %v162_v25 }
 0x12d   :  { %v240_v28 = vpop.f32.mrf.mxu2 }
 0x12e   :  { %v241_v29 = vadd.f32 %v381_v27, %v240_v28 }
 0x130   :  { %384 = vtanh.f32 %v241_v29  ;;  %253 = vrot.lane.b32.xlu1 %v241_v29, %s525_s5 }
 0x135   :  { %v242_v30 = vpop.f32.mrf.mxu2 }
 0x136   :  { %v385_v31 = vpop.eup %384 }
 0x137   :  { %277 = vrot.lane.b32.xlu0 %v385_v31, %s526_s28 }
 0x13f   :  { %248 = vperm.xlu0 %379, %v245_v32  }
 0x1a2   :  { %v254_v37 = vpop.permute.xlu1 %253 }
 0x1a9   :  { %v278_v33 = vpop.permute.xlu0 %277 }
 0x1aa   :  { %v280_v34 = vsub.f32 %v385_v31, %v278_v33 }
 0x1ac   :  { %282 = vrot.lane.b32.xlu1 %v280_v34, %s526_s28 }
 0x1b1   :  { %v249_v35 = vpop.permute.xlu0 %248 }
 0x1b2   :  { %v251_v36 = vmul.f32 %v249_v35, %v241_v29 }
 0x1b4   :  { %v256_v38 = vadd.f32 %v254_v37, %v251_v36 }
 0x1b6   :  { %v357_v39 = vmul.f32 -1.442695, %v256_v38 }
 0x1b8   :  { %386 = vpow2.f32 %v357_v39 }
 0x1be   :  { %v387_v40 = vpop.eup %386 }
 0x1bf   :  { %v260_v41 = vadd.f32 1.0, %v387_v40 }
 0x1c1   :  { %388 = vrcp.f32 %v260_v41  ;;  %v272_v47 = vand.u32 2147483648, %v260_v41  ;;  %vm266_vm3 = vweird.f32 %v260_v41  ;;  %v270_v48 = vand.u32 2147483647, %v260_v41 }
 0x1c3   :  { %v273_v50 = vor.u32 1.1754944e-38, %v272_v47  ;;  %vm271_vm5 = vcmp.eq.f32.partialorder %v270_v48, 8.507059e+37 }
 0x1c7   :  { %v389_v42 = vpop.eup %388 }
 0x1c8   :  { %v262_v43 = vmul.f32 %v389_v42, %v260_v41  ;;  %vm267_vm2 = vweird.f32 %v389_v42 }
 0x1c9   :  { %vm268_vm4 = vmor %vm266_vm3, %vm267_vm2 }
 0x1ca   :  { %v263_v44 = vsub.f32 1.0, %v262_v43 }
 0x1cc   :  { %v264_v45 = vmul.f32 %v389_v42, %v263_v44 }
 0x1ce   :  { %v265_v46 = vadd.f32 %v389_v42, %v264_v45 }
 0x1d0   :  { %v269_v49 = vsel %vm268_vm4, %v389_v42, %v265_v46 }
 0x1d1   :  { %v274_v52 = vsel %vm271_vm5, %v273_v50, %v269_v49 }
 0x21e   :  { %v283_v51 = vpop.permute.xlu1 %282 }
 0x21f   :  { %v285_v53 = vmul.f32 %v283_v51, %v274_v52 }
 0x221   :  { %287 = vrot.lane.b32.xlu2 %v285_v53, %s519_s13 }
 0x27b   :  { %v288_v54 = vpop.permute.xlu2 %287 }
 0x27c   :  { %v290_v55 = vadd.f32 %v385_v31, %v288_v54 }
 0x27e   :  { %291 = vst.msk [vmem:[#allocation10] sm:$0xff] %vm114_vm1, %v290_v55 }
 0x27f   :  { %302 = dma.vmem_to_hbm [thread:$0]  %s298_s7, 128, %s300_s11, [#allocation4]  }
 0x280   :  { %516 = dma.done.wait [#allocation4], 128  }
 0x281   :  { %517 = vsyncadd [#allocation4], 4294967168 }
 0x282   :  { %307 = vsyncpa [#allocation3], 1 }
 0x283   :  { %308 = vsyncpa [#allocation6], 1 }
 0x284   :  { %309 = vsyncpa [#allocation9], 1 }
 0x285   :  { %310 = vsyncpa [#allocation4], 1 }

</bundles_post_ra>
